<compile_context>
chip_gen: v6e
topology: v6e:2x2x1
jax: 0.10.0
libtpu: 0.0.40
codegen_flags: <defaults>
</compile_context>

<pallas_src>
import functools

import jax
import jax.numpy as jnp
from jax import lax
from jax.experimental import pallas as pl
from jax.experimental.pallas import tpu as pltpu


def _round_up(a: int, b: int) -> int:
    return (a + b - 1) // b * b


def _make_ctrl_kernel(max_norm):
    """Return the kernel body with the (static) clip value closed over."""

    def kernel(t_ref, x_ref, wt_ref, wx_ref, b1_ref, w2_ref, b2_ref, o_ref):
        t = t_ref[...]                                  # [bt, 1]  f32
        x = x_ref[...].astype(jnp.bfloat16)             # in-kernel cast (VPU)

        # hidden = GELU([t, x] @ W1 + b1), W1 split into its t-row (wt) and
        # x-rows (wx).  x part: MXU matmul (bf16 in, f32 acc); t part: rank-1
        # VPU broadcast (avoids a degenerate K=1 matmul).
        h = jnp.dot(x, wx_ref[...], preferred_element_type=jnp.float32)
        h = h + t * wt_ref[...] + b1_ref[...]
        h = jax.nn.gelu(h, approximate=True)            # tanh-GELU (EUP)

        y = (
            jnp.dot(h.astype(jnp.bfloat16), w2_ref[...],
                    preferred_element_type=jnp.float32)
            + b2_ref[...]
        )                                               # [bt, D] f32

        if max_norm is not None:
            # clip_and_log: per-row rescale so ||y|| <= max_norm.  rsqrt goes
            # to the EUP slot; guarding sumsq at ~eps^2 matches the original
            # max(norm, 1e-12) behavior for (near-)zero rows.
            sumsq = jnp.sum(y * y, axis=-1, keepdims=True)
            scale = jnp.minimum(
                1.0, max_norm * lax.rsqrt(jnp.maximum(sumsq, 1e-24)))
            y = y * scale
        # TODO(synk): clip_and_log also logs the clipping fraction to wandb —
        # a host-side side effect with no Pallas equivalent.

        o_ref[...] = y.astype(o_ref.dtype)

    return kernel


def prepare_params(params):
    """One-time cast/pad of base_model parameters (reuse across timesteps).

    Pads the hidden dim H up to a multiple of 128 so the hidden activations
    are lane-dense; the extra columns/rows are zero and do not change the
    output or the clip norm.
    """
    H = params["wx"].shape[1]
    Hp = _round_up(H, 128)
    ph = Hp - H
    return {
        "wt": jnp.pad(params["wt"], ((0, 0), (0, ph))).astype(jnp.float32),   # [1, Hp]
        "wx": jnp.pad(params["wx"], ((0, 0), (0, ph))).astype(jnp.bfloat16),  # [D, Hp]
        "b1": jnp.pad(params["b1"], ((0, 0), (0, ph))).astype(jnp.float32),   # [1, Hp]
        "w2": jnp.pad(params["w2"], ((0, ph), (0, 0))).astype(jnp.bfloat16),  # [Hp, D]
        "b2": params["b2"].astype(jnp.float32),                               # [1, D]
    }


def clipped_ctrl_forward(t, x, prepared, clip_model, *,
                         block_b=2048, vmem_budget_bytes=24 << 20):
    """Pallas-backed ClippedCtrl.forward.

    t: [B, 1], x: [B, D] (native dtype; cast to bf16 inside the kernel).
    `prepared` comes from prepare_params(params).  Returns [B, D] float32.

    block_b default (2048) suits v5e/v6e (128 MiB VMEM); the VMEM-budget cap
    keeps the tile safe under v7x's 32 MiB scoped default as D grows.
    """
    B, D = x.shape
    Hp = prepared["wx"].shape[1]

    t = t.astype(jnp.float32)           # [B, 1] — negligible traffic
    xbytes = jnp.dtype(x.dtype).itemsize

    # --- tile size from VMEM budget (double-buffered streams + resident weights)
    per_row = 2 * (4 + D * xbytes + D * 4)                       # t + x + out
    weight_bytes = 2 * (2 * (D * Hp + Hp * D) + 4 * (2 * Hp + D))
    avail = max(vmem_budget_bytes - weight_bytes, 1 << 20)
    bt_cap = max(8, (avail // per_row) // 8 * 8)

    bt = min(block_b, bt_cap, _round_up(B, 8))
    # v7x megacore: give both TensorCores a block when the batch allows it.
    if B >= 16 and pl.cdiv(B, bt) < 2:
        bt = max(8, _round_up(pl.cdiv(B, 2), 8))
    bt = _round_up(bt, 8)
    grid = (pl.cdiv(B, bt),)            # ragged tail handled by Pallas masking

    cost = pl.CostEstimate(
        flops=2 * B * Hp * (2 * D) + 8 * B * D,
        transcendentals=B * (Hp + 1),                    # gelu tanh + rsqrt
        bytes_accessed=(B * (4 + xbytes * D + 4 * D)     # t + x + out
                        + 2 * (D * Hp + Hp * D)          # bf16 weights
                        + 4 * (2 * Hp + D)),             # f32 wt/b1/b2
    )

    out = pl.pallas_call(
        _make_ctrl_kernel(clip_model),
        out_shape=jax.ShapeDtypeStruct((B, D), jnp.float32),
        grid=grid,
        in_specs=[
            pl.BlockSpec((bt, 1), lambda i: (i, 0)),     # t   (streamed)
            pl.BlockSpec((bt, D), lambda i: (i, 0)),     # x   (streamed)
            pl.BlockSpec((1, Hp), lambda i: (0, 0)),     # wt  (resident)
            pl.BlockSpec((D, Hp), lambda i: (0, 0)),     # wx  (resident)
            pl.BlockSpec((1, Hp), lambda i: (0, 0)),     # b1  (resident)
            pl.BlockSpec((Hp, D), lambda i: (0, 0)),     # w2  (resident)
            pl.BlockSpec((1, D), lambda i: (0, 0)),      # b2  (resident)
        ],
        out_specs=pl.BlockSpec((bt, D), lambda i: (i, 0)),
        compiler_params=pltpu.CompilerParams(
            dimension_semantics=("parallel",),
        ),
        cost_estimate=cost,
    )(t, x, prepared["wt"], prepared["wx"], prepared["b1"],
      prepared["w2"], prepared["b2"])

    # TODO(synk): for the real SDE sampler with tiny per-step batches, the
    # biggest lever is batching several timesteps per pallas_call (weights
    # resident across a steps grid axis) — a call-site restructuring.
    return out


def _reference(t, x, params, clip_model):
    """Pure-JAX reference mirroring the kernel's mixed precision."""
    h = (
        jnp.dot(x.astype(jnp.bfloat16), params["wx"].astype(jnp.bfloat16),
                preferred_element_type=jnp.float32)
        + t * params["wt"] + params["b1"]
    )
    h = jax.nn.gelu(h, approximate=True)
    y = (
        jnp.dot(h.astype(jnp.bfloat16), params["w2"].astype(jnp.bfloat16),
                preferred_element_type=jnp.float32)
        + params["b2"]
    )
    if clip_model is not None:
        nrm = jnp.sqrt(jnp.sum(y * y, axis=-1, keepdims=True))
        y = y * jnp.minimum(1.0, clip_model / jnp.maximum(nrm, 1e-12))
    return y


if __name__ == "__main__":
    B, D, H = 8, 32, 64
    clip_model = 1.5

    key = jax.random.PRNGKey(0)
    k_t, k_x, k1, k2, k3, k4, k5 = jax.random.split(key, 7)

    t = jax.random.uniform(k_t, (B, 1), dtype=jnp.float32)
    x = jax.random.normal(k_x, (B, D), dtype=jnp.float32)

    # Deterministic synthetic base_model parameters.
    params = {
        "wt": 0.5 * jax.random.normal(k1, (1, H), dtype=jnp.float32),
        "wx": 0.5 * jax.random.normal(k2, (D, H), dtype=jnp.float32) / jnp.sqrt(D),
        "b1": 0.1 * jax.random.normal(k3, (1, H), dtype=jnp.float32),
        "w2": 0.5 * jax.random.normal(k4, (H, D), dtype=jnp.float32) / jnp.sqrt(H),
        "b2": 0.1 * jax.random.normal(k5, (1, D), dtype=jnp.float32),
    }

    # One-time parameter prep + jitted forward: per-SDE-timestep calls reuse
    # both (amortizes launch overhead and weight cast/pad).
    prepared = prepare_params(params)
    fwd = jax.jit(functools.partial(clipped_ctrl_forward, clip_model=clip_model))

    out = fwd(t, x, prepared)
    out = jax.block_until_ready(out)

    ref = _reference(t, x, params, clip_model)
    assert out.shape == (B, D)
    assert jnp.allclose(out, ref, atol=1e-3, rtol=1e-3), "mismatch vs reference"
    # All rows must respect the clip.
    assert bool(jnp.all(jnp.linalg.norm(out, axis=-1) <= clip_model + 1e-3))

    print("KERNEL_OK")
</pallas_src>

<mosaic_0001>
module attributes {stable_mosaic.version = 11 : i64} {
  func.func @kernel(%arg0: i32, %arg1: memref<8x1xf32, #tpu.memory_space<vmem>>, %arg2: memref<8x32xf32, #tpu.memory_space<vmem>>, %arg3: memref<1x128xf32, #tpu.memory_space<vmem>>, %arg4: memref<32x128xbf16, #tpu.memory_space<vmem>>, %arg5: memref<1x128xf32, #tpu.memory_space<vmem>>, %arg6: memref<128x32xbf16, #tpu.memory_space<vmem>>, %arg7: memref<1x32xf32, #tpu.memory_space<vmem>>, %arg8: memref<8x32xf32, #tpu.memory_space<vmem>>) attributes {dimension_semantics = [#tpu.dimension_semantics<parallel>], iteration_bounds = array<i64: 1>, scalar_prefetch = 0 : i64, scratch_operands = 0 : i64, tpu.core_type = #tpu.core_type<tc>, window_params = [{transform_indices = @transform_0, window_bounds = array<i64: 8, 1>}, {transform_indices = @transform_1, window_bounds = array<i64: 8, 32>}, {pipeline_mode = #tpu.pipeline_mode<synchronous>, transform_indices = @transform_2, window_bounds = array<i64: 1, 128>}, {pipeline_mode = #tpu.pipeline_mode<synchronous>, transform_indices = @transform_3, window_bounds = array<i64: 32, 128>}, {pipeline_mode = #tpu.pipeline_mode<synchronous>, transform_indices = @transform_4, window_bounds = array<i64: 1, 128>}, {pipeline_mode = #tpu.pipeline_mode<synchronous>, transform_indices = @transform_5, window_bounds = array<i64: 128, 32>}, {pipeline_mode = #tpu.pipeline_mode<synchronous>, transform_indices = @transform_6, window_bounds = array<i64: 1, 32>}, {transform_indices = @transform_7, window_bounds = array<i64: 8, 32>}]} {
    %c0 = arith.constant 0 : index
    %c0_0 = arith.constant 0 : index
    %0 = vector.load %arg1[%c0, %c0_0] : memref<8x1xf32, #tpu.memory_space<vmem>>, vector<8x1xf32>
    %c0_1 = arith.constant 0 : index
    %c0_2 = arith.constant 0 : index
    %1 = vector.load %arg2[%c0_1, %c0_2] : memref<8x32xf32, #tpu.memory_space<vmem>>, vector<8x32xf32>
    %2 = arith.truncf %1 : vector<8x32xf32> to vector<8x32xbf16>
    %c0_3 = arith.constant 0 : index
    %c0_4 = arith.constant 0 : index
    %3 = vector.load %arg4[%c0_3, %c0_4] : memref<32x128xbf16, #tpu.memory_space<vmem>>, vector<32x128xbf16>
    %cst = arith.constant dense<0.000000e+00> : vector<8x128xf32>
    %4 = tpu.matmul %2, %3, %cst {dimension_numbers = #tpu.dot_dimension_numbers<[1], [0], [0], [1], [0, 0, 1, 1], [], []>} : vector<8x32xbf16>, vector<32x128xbf16>, vector<8x128xf32> -> vector<8x128xf32>
    %c0_5 = arith.constant 0 : index
    %c0_6 = arith.constant 0 : index
    %5 = vector.load %arg3[%c0_5, %c0_6] : memref<1x128xf32, #tpu.memory_space<vmem>>, vector<1x128xf32>
    %6 = vector.broadcast %0 : vector<8x1xf32> to vector<8x128xf32>
    %7 = vector.broadcast %5 : vector<1x128xf32> to vector<8x128xf32>
    %8 = arith.mulf %6, %7 : vector<8x128xf32>
    %9 = arith.addf %4, %8 : vector<8x128xf32>
    %c0_7 = arith.constant 0 : index
    %c0_8 = arith.constant 0 : index
    %10 = vector.load %arg5[%c0_7, %c0_8] : memref<1x128xf32, #tpu.memory_space<vmem>>, vector<1x128xf32>
    %11 = vector.broadcast %10 : vector<1x128xf32> to vector<8x128xf32>
    %12 = arith.addf %9, %11 : vector<8x128xf32>
    %13 = arith.mulf %12, %12 : vector<8x128xf32>
    %14 = arith.mulf %12, %13 : vector<8x128xf32>
    %cst_9 = arith.constant 4.471500e-02 : f32
    %15 = vector.broadcast %cst_9 : f32 to vector<8x128xf32>
    %16 = arith.mulf %15, %14 : vector<8x128xf32>
    %17 = arith.addf %12, %16 : vector<8x128xf32>
    %cst_10 = arith.constant 0.797884583 : f32
    %18 = vector.broadcast %cst_10 : f32 to vector<8x128xf32>
    %19 = arith.mulf %18, %17 : vector<8x128xf32>
    %20 = math.tanh %19 : vector<8x128xf32>
    %cst_11 = arith.constant 1.000000e+00 : f32
    %21 = vector.broadcast %cst_11 : f32 to vector<8x128xf32>
    %22 = arith.addf %21, %20 : vector<8x128xf32>
    %cst_12 = arith.constant 5.000000e-01 : f32
    %23 = vector.broadcast %cst_12 : f32 to vector<8x128xf32>
    %24 = arith.mulf %23, %22 : vector<8x128xf32>
    %25 = arith.mulf %12, %24 : vector<8x128xf32>
    %26 = arith.truncf %25 : vector<8x128xf32> to vector<8x128xbf16>
    %c0_13 = arith.constant 0 : index
    %c0_14 = arith.constant 0 : index
    %27 = vector.load %arg6[%c0_13, %c0_14] : memref<128x32xbf16, #tpu.memory_space<vmem>>, vector<128x32xbf16>
    %cst_15 = arith.constant dense<0.000000e+00> : vector<8x32xf32>
    %28 = tpu.matmul %26, %27, %cst_15 {dimension_numbers = #tpu.dot_dimension_numbers<[1], [0], [0], [1], [0, 0, 1, 1], [], []>} : vector<8x128xbf16>, vector<128x32xbf16>, vector<8x32xf32> -> vector<8x32xf32>
    %c0_16 = arith.constant 0 : index
    %c0_17 = arith.constant 0 : index
    %29 = vector.load %arg7[%c0_16, %c0_17] : memref<1x32xf32, #tpu.memory_space<vmem>>, vector<1x32xf32>
    %30 = vector.broadcast %29 : vector<1x32xf32> to vector<8x32xf32>
    %31 = arith.addf %28, %30 : vector<8x32xf32>
    %32 = arith.mulf %31, %31 : vector<8x32xf32>
    %cst_18 = arith.constant dense<0.000000e+00> : vector<8xf32>
    %33 = vector.multi_reduction <add>, %32, %cst_18 [1] : vector<8x32xf32> to vector<8xf32>
    %34 = vector.shape_cast %33 : vector<8xf32> to vector<8x1xf32>
    %cst_19 = arith.constant 1.000000e-24 : f32
    %35 = vector.broadcast %cst_19 : f32 to vector<8x1xf32>
    %36 = arith.maximumf %34, %35 : vector<8x1xf32>
    %37 = math.rsqrt %36 : vector<8x1xf32>
    %cst_20 = arith.constant 1.500000e+00 : f32
    %38 = vector.broadcast %cst_20 : f32 to vector<8x1xf32>
    %39 = arith.mulf %38, %37 : vector<8x1xf32>
    %cst_21 = arith.constant 1.000000e+00 : f32
    %40 = vector.broadcast %cst_21 : f32 to vector<8x1xf32>
    %41 = arith.minimumf %40, %39 : vector<8x1xf32>
    %42 = vector.broadcast %41 : vector<8x1xf32> to vector<8x32xf32>
    %43 = arith.mulf %31, %42 : vector<8x32xf32>
    %c0_22 = arith.constant 0 : index
    %c0_23 = arith.constant 0 : index
    %44 = vector.load %arg8[%c0_22, %c0_23] : memref<8x32xf32, #tpu.memory_space<vmem>>, vector<8x32xf32>
    tpu.vector_store %arg8[%c0_22, %c0_23], %43 {strides = array<i32>} : memref<8x32xf32, #tpu.memory_space<vmem>>, vector<8x32xf32>,
    return
  }
  func.func @transform_0(%arg0: i32) -> (i32, i32) {
    %c0_i32 = arith.constant 0 : i32
    %c0_i32_0 = arith.constant 0 : i32
    return %arg0, %c0_i32 : i32, i32
  }
  func.func @transform_1(%arg0: i32) -> (i32, i32) {
    %c0_i32 = arith.constant 0 : i32
    %c0_i32_0 = arith.constant 0 : i32
    return %arg0, %c0_i32 : i32, i32
  }
  func.func @transform_2(%arg0: i32) -> (i32, i32) {
    %c0_i32 = arith.constant 0 : i32
    %c0_i32_0 = arith.constant 0 : i32
    %c0_i32_1 = arith.constant 0 : i32
    return %c0_i32, %c0_i32_0 : i32, i32
  }
  func.func @transform_3(%arg0: i32) -> (i32, i32) {
    %c0_i32 = arith.constant 0 : i32
    %c0_i32_0 = arith.constant 0 : i32
    %c0_i32_1 = arith.constant 0 : i32
    return %c0_i32, %c0_i32_0 : i32, i32
  }
  func.func @transform_4(%arg0: i32) -> (i32, i32) {
    %c0_i32 = arith.constant 0 : i32
    %c0_i32_0 = arith.constant 0 : i32
    %c0_i32_1 = arith.constant 0 : i32
    return %c0_i32, %c0_i32_0 : i32, i32
  }
  func.func @transform_5(%arg0: i32) -> (i32, i32) {
    %c0_i32 = arith.constant 0 : i32
    %c0_i32_0 = arith.constant 0 : i32
    %c0_i32_1 = arith.constant 0 : i32
    return %c0_i32, %c0_i32_0 : i32, i32
  }
  func.func @transform_6(%arg0: i32) -> (i32, i32) {
    %c0_i32 = arith.constant 0 : i32
    %c0_i32_0 = arith.constant 0 : i32
    %c0_i32_1 = arith.constant 0 : i32
    return %c0_i32, %c0_i32_0 : i32, i32
  }
  func.func @transform_7(%arg0: i32) -> (i32, i32) {
    %c0_i32 = arith.constant 0 : i32
    %c0_i32_0 = arith.constant 0 : i32
    return %arg0, %c0_i32 : i32, i32
  }
}

</mosaic_0001>

<bundles_post_ra>
// kernel: clipped_ctrl_forward.1
= control target key start
LH: loop header
LB: loop body
LE: loop exit
PB: predicated region body
PF: predicated region fallthrough
CT: control target
= control target key end

     0   :  { %v352_v1 = vmov 0.0   ;;  %vm353_vm0 = vmmov 0   ;;  %vm60_vm1 = vcmask 261120   ;;  %v354_v5 = vmov 0   ;;  %s447_s0 = inlined_call_operand.vmem [shape: f32[8,1], index: 0, kind: input, shape index: {}]   ;;  %s448_s1 = inlined_call_operand.vmem [shape: f32[8,32], index: 1, kind: input, shape index: {}]   ;;  %s449_s2 = inlined_call_operand.vmem [shape: f32[1,128], index: 2, kind: input, shape index: {}]   ;;  %s450_s3 = inlined_call_operand.vmem [shape: bf16[32,128], index: 3, kind: input, shape index: {}]   ;;  %s451_s4 = inlined_call_operand.vmem [shape: f32[1,128], index: 4, kind: input, shape index: {}]   ;;  %s452_s5 = inlined_call_operand.vmem [shape: bf16[128,32], index: 5, kind: input, shape index: {}]   ;;  %s453_s6 = inlined_call_operand.vmem [shape: f32[1,32], index: 6, kind: input, shape index: {}]   ;;  %s454_s7 = inlined_call_operand.hbm [shape: f32[8,32], index: 7, kind: output, shape index: {}]  }
   0x1   :  { %v316_v0 = vld [vmem:[%s450_s3 + $0x8] sm:$0xff]   ;;  %283 = vmatprep.subr.bf16.mxu0 %v352_v1  ;;  %291 = vmatprep.subr.bf16.mxu1 %v352_v1  ;;  %v317_v2 = vld [vmem:[%s450_s3] sm:$0xff]  }
   0x2   :  { %284 = vmatpush3.bf16.msra.mxu0 %v316_v0  ;;  %287 = vmatprep.mubr.msk.bf16.mxu0 %vm353_vm0, %v352_v1  ;;  %v29_v3 = vld [vmem:[%s448_s1] sm:$0xff] }
   0x3   :  { %v28_v4 = vld [vmem:[%s447_s0] sm:$0xff]  ;;  %285 = vmatprep.subr.bf16.mxu0 %v352_v1  ;;  %315 = vset.pattern.permute.xlu0 %v354_v5  ;;  %v30_v6 = vpack.c.bf16 %v29_v3, %v29_v3 }
   0x4   :  { %38 = vperm.xlu0 %315, %v28_v4   ;;  %307 = vmatprep.mubr.msk.bf16.mxu1 %vm353_vm0, %v352_v1 }
   0x6   :  { %286 = vmatpush3.bf16.msra.mxu0 %v317_v2 }
   0x7   :  { %12 = vsyncpa [#allocation3], 0  ;;  %v318_v7 = vld [vmem:[%s452_s5 + $0x38] sm:$0xff]   ;;  %v319_v8 = vld [vmem:[%s452_s5 + $0x30] sm:$0xff]  }
   0x8   :  { %292 = vmatpush3.bf16.msra.mxu1 %v318_v7  ;;  %v320_v9 = vld [vmem:[%s452_s5 + $0x28] sm:$0xff]   ;;  %v321_v10 = vld [vmem:[%s452_s5 + $0x20] sm:$0xff]   ;;  %v322_v11 = vld [vmem:[%s452_s5 + $0x18] sm:$0xff]  }
   0x9   :  { %288 = vmatmul.mubr.msk.bf16.vlgmr.msra.gmra.mxu0 %vm60_vm1, %v30_v6  ;;  %293 = vmatprep.subr.bf16.mxu1 %v352_v1  ;;  %v323_v12 = vld [vmem:[%s452_s5 + $0x10] sm:$0xff]   ;;  %v324_v13 = vld [vmem:[%s452_s5 + $0x8] sm:$0xff]   ;;  %v325_v14 = vld [vmem:[%s452_s5] sm:$0xff]  }
   0xa   :  { %v257_v15 = vld [vmem:[%s449_s2] ss:$0 sm:$0xff] }
   0xb   :  { %v261_v19 = vld [vmem:[%s451_s4] ss:$0 sm:$0xff]  ;;  %s355_s4 = smov [#allocation2]  }
   0xc   :  { %294 = vmatpush3.bf16.msra.mxu1 %v319_v8  ;;  %v262_v35 = vld [vmem:[%s453_s6] ss:$0 sm:$0xff]  ;;  %s249_s26 = sshll.u32 %s355_s4, 4  ;;  %s250_s26 = int_to_ptr.vmem [resolvable:$true] %s249_s26 }
   0xd   :  { %295 = vmatprep.subr.bf16.mxu1 %v352_v1  ;;  %s330_s6 = scalar_lea.vmem %s250_s26, 128  ;;  %p335_p1 = scmp.lt.s32.totalorder %s250_s26, %s250_s26 }
   0xe   :  { %p331_p0 = scmp.ne.s32.totalorder %s250_s26, %s330_s6  ;;  %p336_p2 = scmp.lt.s32.totalorder %s330_s6, %s330_s6 }
  0x10   :  { %296 = vmatpush3.bf16.msra.mxu1 %v320_v9  ;;  %p337_p3 = por %p336_p2, %p335_p1 }
  0x11   :  { %297 = vmatprep.subr.bf16.mxu1 %v352_v1 }
  0x12   :  { %p338_p4 = pnand %p337_p3, %p331_p0 }
  0x14   :  { %298 = vmatpush3.bf16.msra.mxu1 %v321_v10 }
  0x15   :  { %299 = vmatprep.subr.bf16.mxu1 %v352_v1 }
  0x18   :  { %300 = vmatpush3.bf16.msra.mxu1 %v322_v11 }
  0x19   :  { %301 = vmatprep.subr.bf16.mxu1 %v352_v1 }
  0x1c   :  { %302 = vmatpush3.bf16.msra.mxu1 %v323_v12 }
  0x1d   :  { %303 = vmatprep.subr.bf16.mxu1 %v352_v1 }
  0x20   :  { %304 = vmatpush3.bf16.msra.mxu1 %v324_v13 }
  0x21   :  { %305 = vmatprep.subr.bf16.mxu1 %v352_v1 }
  0x24   :  { %306 = vmatpush3.bf16.msra.mxu1 %v325_v14 }
  0x7f   :  { %v39_v16 = vpop.permute.xlu0 %38 }
  0x80   :  { %v47_v17 = vmul.f32 %v257_v15, %v39_v16 }
  0xc9   :  { %v98_v18 = vpop.f32.mrf.mxu0 }
  0xca   :  { %v99_v20 = vadd.f32 %v98_v18, %v47_v17 }
  0xcb   :  { %v289_v21 = vpop.f32.mrf.mxu0 }
  0xcc   :  { %v111_v22 = vadd.f32 %v261_v19, %v99_v20 }
  0xcd   :  { %v101_v23 = vpop.f32.mrf.mxu0 }
  0xce   :  { %v112_v24 = vmul.f32 %v111_v22, %v111_v22 }
  0xcf   :  { %v290_v25 = vpop.f32.mrf.mxu0 }
  0xd0   :  { %v113_v26 = vmul.f32 %v112_v24, %v111_v22 }
  0xd2   :  { %v114_v27 = vmul.f32 0.044715, %v113_v26 }
  0xd4   :  { %v115_v28 = vadd.f32 %v114_v27, %v111_v22 }
  0xd6   :  { %v116_v29 = vmul.f32 0.7978846, %v115_v28 }
  0xd8   :  { %326 = vtanh.f32 %v116_v29 }
  0xe5   :  { %v327_v30 = vpop.eup %326 }
  0xe6   :  { %v118_v31 = vadd.f32 1.0, %v327_v30 }
  0xe8   :  { %v119_v32 = vmul.f32 0.5, %v118_v31 }
  0xea   :  { %v120_v33 = vmul.f32 %v119_v32, %v111_v22 }
  0xec   :  { %v121_v34 = vpack.c.bf16 %v120_v33, %v120_v33 }
  0xee   :  { %308 = vmatmul.mubr.bf16.vlgmr.msra.gmra.mxu1 %v121_v34 }
 0x1ae   :  { %v227_v36 = vpop.f32.mrf.mxu1 }
 0x1af   :  { %v228_v37 = vadd.f32 %v262_v35, %v227_v36 }
 0x1b0   :  { %v309_v38 = vpop.f32.mrf.mxu1 }
 0x1b1   :  { %v233_v39 = vmul.f32 %v228_v37, %v228_v37 }
 0x1b2   :  { %v230_v40 = vpop.f32.mrf.mxu1 }
 0x1b3   :  { %v234_v41 = vsel %vm60_vm1, %v233_v39, 0.0 }
 0x1b4   :  { %235 = vadd.xlane.f32.xlu0 %v234_v41  ;;  %v310_v42 = vpop.f32.mrf.mxu1 }
 0x23d   :  { %v236_v43 = vpop.xlane.xlu0 %235 }
 0x23e   :  { %v237_v44 = vmax.f32 %v236_v43, 1e-24 }
 0x240   :  { %328 = vrsqrt.f32 %v237_v44 }
 0x24d   :  { %v329_v45 = vpop.eup %328 }
 0x24e   :  { %v239_v46 = vmul.f32 1.5, %v329_v45 }
 0x250   :  { %v240_v47 = vmin.f32 %v239_v46, 1.0 }
 0x252   :  { %v241_v48 = vmul.f32 %v240_v47, %v228_v37 }
 0x254   :  { %242 = vst.msk [vmem:[#allocation2] sm:$0xff] %vm60_vm1, %v241_v48 }
 0x255   :  { %341 = shalt.err (!%p338_p4)
}
 0x256   :  { %252 = dma.vmem_to_hbm [thread:$0]  %s250_s26, 128, %s454_s7, [#allocation3]  }
 0x257   :  { %350 = dma.done.wait [#allocation3], 128  }
 0x258   :  { %351 = vsyncadd [#allocation3], 4294967168 }
 0x259   :  { %256 = vsyncpa [#allocation3], 1 }

</bundles_post_ra>
